<compile_context>
chip_gen: v5e
topology: v5e:2x2
jax: 0.10.0
libtpu: 0.0.40
codegen_flags: <defaults>
</compile_context>

<pallas_src>
import jax
import jax.numpy as jnp
from jax.experimental import pallas as pl
from jax.experimental.pallas import tpu as pltpu


# ----------------------------- Pallas kernel --------------------------------


def _diffusion_i2sb_kernel(x_ref, w1t_ref, b1_ref, w2s_ref, bias2_ref, out_ref):
    """Per-(batch, HW-tile) body.  Channels on sublanes, pixels on lanes.

    x_ref:     (1, Cin, T_HW)  bf16
    w1t_ref:   (Cmid, Cin)     f32   = W1^T
    b1_ref:    (Cmid, 1)       f32
    w2s_ref:   (1, Cout, Cmid) f32   = W2^T * (1 + scale_b)   (FiLM folded)
    bias2_ref: (1, Cout, 1)    f32   = W2^T @ shift_b + b2
    out_ref:   (1, Cout, T_HW) bf16
    """
    # NOTE: channel dims (8/32/4) under-fill the MXU; harmless while HBM-bound.
    # If real-model channel counts are used, pad channels toward 128-multiples.
    x = x_ref[0].astype(jnp.float32)                                   # (Cin, T)
    h = jnp.dot(w1t_ref[...], x, preferred_element_type=jnp.float32)   # (Cmid, T)
    h = jax.nn.silu(h + b1_ref[...])
    out = jnp.dot(w2s_ref[0], h, preferred_element_type=jnp.float32)   # (Cout, T)
    out_ref[0] = (out + bias2_ref[0]).astype(out_ref.dtype)            # lane-dense


# ------------------------------ JAX wrapper ----------------------------------


def _vmem_budget_bytes():
    """VMEM budget per generation (<= ~48 MiB on v7x, <= ~100 MiB on v5e/v6e)."""
    try:
        phys = pltpu.get_tpu_info().vmem_capacity_bytes
    except Exception:
        phys = 64 * 1024 * 1024  # conservative default (v7x-sized)
    return min(int(phys * 3 // 4), 100 * 1024 * 1024)


def _pick_hw_tile(hw, cin, cmid, cout, budget_bytes, lane_cap=256 * 1024):
    """Largest 128-multiple HW tile fitting the VMEM budget (capped)."""
    # Approximate VMEM bytes per lane of a tile:
    #   double-buffered bf16 x & out pipeline blocks + f32 in-kernel temporaries.
    per_lane = 2 * 2 * (cin + cout)               # 2 buffers * 2 B * (x + out)
    per_lane += 4 * (cin + 2 * cmid + cout)       # f32 x-cast, h, silu(h), out
    cap = max(128, (budget_bytes // per_lane) // 128 * 128)
    cap = min(cap, lane_cap)
    hw128 = pl.cdiv(hw, 128) * 128
    return min(hw128, cap)


def diffusion_i2sb_forward(params, noise_levels, x_nchw, steps, cond_nchw=None,
                           cond=True):
    """Equivalent of DiffusionI2SB.forward(x, steps, cond)."""
    assert steps.ndim == 1 and steps.shape[0] == x_nchw.shape[0]
    if cond:
        assert cond_nchw is not None
        x_nchw = jnp.concatenate([x_nchw, cond_nchw], axis=1)   # channel concat
    B, C, H, W = x_nchw.shape
    HW = H * W

    cmid = params["w1"].shape[1]
    cout = params["w2"].shape[1]

    # --- time MLP + FiLM folding: O(B*E^2), done once in XLA (not per pixel) ---
    t = noise_levels.astype(jnp.float32)[steps]                        # (B,)
    freqs = params["freqs"]
    args = t[:, None] * freqs[None, :]                                 # (B, half)
    emb = jnp.concatenate([jnp.sin(args), jnp.cos(args)], axis=-1)     # (B, E)
    temb = jax.nn.silu(emb @ params["we1"] + params["be1"])
    ss = temb @ params["we2"] + params["be2"]                          # (B, 2*Cmid)
    scale, shift = ss[:, :cmid], ss[:, cmid:]

    w1t = params["w1"].T.astype(jnp.float32)                           # (Cmid, Cin)
    b1c = params["b1"].reshape(cmid, 1).astype(jnp.float32)
    w2t = params["w2"].T.astype(jnp.float32)                           # (Cout, Cmid)
    w2s = (w2t[None, :, :] * (1.0 + scale)[:, None, :]).astype(jnp.float32)
    bias2 = jnp.einsum("om,bm->bo", w2t, shift) + params["b2"][None, :]
    bias2 = bias2[:, :, None].astype(jnp.float32)                      # (B, Cout, 1)

    # --- bf16, lane-dense (B, C, HW) layout with HW padded to a tile multiple ---
    budget = _vmem_budget_bytes()
    t_hw = _pick_hw_tile(HW, C, cmid, cout, budget)
    hw_pad = pl.cdiv(HW, t_hw) * t_hw
    n_hw = hw_pad // t_hw

    x = x_nchw.reshape(B, C, HW).astype(jnp.bfloat16)    # free NCHW reshape
    if hw_pad != HW:
        x = jnp.pad(x, ((0, 0), (0, 0), (0, hw_pad - HW)))

    out = pl.pallas_call(
        _diffusion_i2sb_kernel,
        out_shape=jax.ShapeDtypeStruct((B, cout, hw_pad), jnp.bfloat16),
        grid=(B, n_hw),
        in_specs=[
            pl.BlockSpec((1, C, t_hw), lambda b, h: (b, 0, h)),        # x
            pl.BlockSpec((cmid, C), lambda b, h: (0, 0)),              # W1^T
            pl.BlockSpec((cmid, 1), lambda b, h: (0, 0)),              # b1
            pl.BlockSpec((1, cout, cmid), lambda b, h: (b, 0, 0)),     # W2s[b]
            pl.BlockSpec((1, cout, 1), lambda b, h: (b, 0, 0)),        # bias2[b]
        ],
        out_specs=pl.BlockSpec((1, cout, t_hw), lambda b, h: (b, 0, h)),
        compiler_params=pltpu.CompilerParams(
            dimension_semantics=("parallel", "parallel"),  # B and HW independent
            vmem_limit_bytes=budget,
        ),
    )(x, w1t, b1c, w2s, bias2)

    # (B, Cout, HW_pad) -> slice padding -> NCHW (free reshape); f32 for parity.
    return out[:, :, :HW].astype(jnp.float32).reshape(B, cout, H, W)


# -------------------------- pure-JAX reference -------------------------------


def diffusion_i2sb_reference(params, noise_levels, x_nchw, steps,
                             cond_nchw=None, cond=True):
    t = noise_levels[steps]                                     # (B,)
    xx = jnp.concatenate([x_nchw, cond_nchw], axis=1) if cond else x_nchw
    B, C, H, W = xx.shape
    x = jnp.transpose(xx, (0, 2, 3, 1)).reshape(B, H * W, C).astype(jnp.float32)

    freqs = params["freqs"]                                     # (half,)
    args = t[:, None] * freqs[None, :]
    emb = jnp.concatenate([jnp.sin(args), jnp.cos(args)], axis=-1)
    temb = jax.nn.silu(emb @ params["we1"] + params["be1"])
    ss = temb @ params["we2"] + params["be2"]
    cmid = params["w1"].shape[1]
    scale, shift = ss[:, :cmid], ss[:, cmid:]

    h = jax.nn.silu(x @ params["w1"] + params["b1"])
    h = h * (1.0 + scale[:, None, :]) + shift[:, None, :]
    out = h @ params["w2"] + params["b2"]
    cout = params["w2"].shape[1]
    return out.reshape(B, H, W, cout).transpose(0, 3, 1, 2)


# --------------------------------- main ---------------------------------------


def _init_params(key, cin, cmid, cout, emb_dim):
    half = emb_dim // 2
    ks = jax.random.split(key, 9)
    scale = lambda fan_in: 1.0 / jnp.sqrt(fan_in)
    freqs = jnp.exp(-jnp.log(10000.0) * jnp.arange(half, dtype=jnp.float32) / half)
    return {
        "freqs": freqs,                                                    # (half,)
        "w1":  jax.random.normal(ks[0], (cin, cmid), jnp.float32) * scale(cin),
        "b1":  jax.random.normal(ks[1], (cmid,), jnp.float32) * 0.1,
        "we1": jax.random.normal(ks[2], (emb_dim, emb_dim), jnp.float32) * scale(emb_dim),
        "be1": jax.random.normal(ks[3], (emb_dim,), jnp.float32) * 0.1,
        "we2": jax.random.normal(ks[4], (emb_dim, 2 * cmid), jnp.float32) * scale(emb_dim),
        "be2": jax.random.normal(ks[5], (2 * cmid,), jnp.float32) * 0.1,
        "w2":  jax.random.normal(ks[6], (cmid, cout), jnp.float32) * scale(cmid),
        "b2":  jax.random.normal(ks[7], (cout,), jnp.float32) * 0.1,
    }


if __name__ == "__main__":
    key = jax.random.PRNGKey(0)
    k_x, k_cond, k_p = jax.random.split(key, 3)

    B, Cx, Ccond, H, W = 2, 4, 4, 16, 16
    Cmid, Cout, Edim = 32, 4, 32
    T = 1000

    x = jax.random.normal(k_x, (B, Cx, H, W), jnp.float32)        # NCHW
    cond_img = jax.random.normal(k_cond, (B, Ccond, H, W), jnp.float32)
    noise_levels = jnp.linspace(1e-4, 0.999, T, dtype=jnp.float32)
    steps = jnp.array([3, 500], dtype=jnp.int32)                  # (B,)

    params = _init_params(k_p, Cx + Ccond, Cmid, Cout, Edim)

    out = diffusion_i2sb_forward(params, noise_levels, x, steps,
                                 cond_nchw=cond_img, cond=True)
    out = jax.block_until_ready(out)

    # Reference uses the same bf16-quantized inputs so the comparison isolates
    # kernel correctness from the intentional bf16 I/O rounding of the kernel.
    x_q = x.astype(jnp.bfloat16).astype(jnp.float32)
    cond_q = cond_img.astype(jnp.bfloat16).astype(jnp.float32)
    ref = diffusion_i2sb_reference(params, noise_levels, x_q, steps,
                                   cond_nchw=cond_q, cond=True)

    assert out.shape == (B, Cout, H, W)
    max_err = float(jnp.max(jnp.abs(out - ref)))
    assert jnp.allclose(out, ref, rtol=2e-2, atol=2e-2), max_err

    print("KERNEL_OK")
</pallas_src>

<mosaic_0001>
module attributes {stable_mosaic.version = 11 : i64} {
  func.func @_diffusion_i2sb_kernel(%arg0: i32, %arg1: i32, %arg2: memref<1x8x256xbf16, #tpu.memory_space<vmem>>, %arg3: memref<32x8xf32, #tpu.memory_space<vmem>>, %arg4: memref<32x1xf32, #tpu.memory_space<vmem>>, %arg5: memref<1x4x32xf32, #tpu.memory_space<vmem>>, %arg6: memref<1x4x1xf32, #tpu.memory_space<vmem>>, %arg7: memref<1x4x256xbf16, #tpu.memory_space<vmem>>) attributes {dimension_semantics = [#tpu.dimension_semantics<parallel>, #tpu.dimension_semantics<parallel>], iteration_bounds = array<i64: 2, 1>, scalar_prefetch = 0 : i64, scratch_operands = 0 : i64, tpu.core_type = #tpu.core_type<tc>, window_params = [{transform_indices = @transform_0, window_bounds = array<i64: 1, 8, 256>}, {pipeline_mode = #tpu.pipeline_mode<synchronous>, transform_indices = @transform_1, window_bounds = array<i64: 32, 8>}, {pipeline_mode = #tpu.pipeline_mode<synchronous>, transform_indices = @transform_2, window_bounds = array<i64: 32, 1>}, {transform_indices = @transform_3, window_bounds = array<i64: 1, 4, 32>}, {transform_indices = @transform_4, window_bounds = array<i64: 1, 4, 1>}, {transform_indices = @transform_5, window_bounds = array<i64: 1, 4, 256>}]} {
    %c0 = arith.constant 0 : index
    %c0_0 = arith.constant 0 : index
    %c0_1 = arith.constant 0 : index
    %0 = vector.load %arg2[%c0, %c0_0, %c0_1] : memref<1x8x256xbf16, #tpu.memory_space<vmem>>, vector<1x8x256xbf16>
    %1 = vector.shape_cast %0 : vector<1x8x256xbf16> to vector<8x256xbf16>
    %2 = arith.extf %1 : vector<8x256xbf16> to vector<8x256xf32>
    %c0_2 = arith.constant 0 : index
    %c0_3 = arith.constant 0 : index
    %3 = vector.load %arg3[%c0_2, %c0_3] : memref<32x8xf32, #tpu.memory_space<vmem>>, vector<32x8xf32>
    %cst = arith.constant dense<0.000000e+00> : vector<32x256xf32>
    %4 = tpu.matmul %3, %2, %cst {dimension_numbers = #tpu.dot_dimension_numbers<[1], [0], [0], [1], [0, 0, 1, 1], [], []>} : vector<32x8xf32>, vector<8x256xf32>, vector<32x256xf32> -> vector<32x256xf32>
    %c0_4 = arith.constant 0 : index
    %c0_5 = arith.constant 0 : index
    %5 = vector.load %arg4[%c0_4, %c0_5] : memref<32x1xf32, #tpu.memory_space<vmem>>, vector<32x1xf32>
    %6 = vector.broadcast %5 : vector<32x1xf32> to vector<32x256xf32>
    %7 = arith.addf %4, %6 : vector<32x256xf32>
    %8 = arith.negf %7 : vector<32x256xf32>
    %9 = math.exp %8 : vector<32x256xf32>
    %cst_6 = arith.constant 1.000000e+00 : f32
    %10 = vector.broadcast %cst_6 : f32 to vector<32x256xf32>
    %11 = arith.addf %10, %9 : vector<32x256xf32>
    %12 = arith.divf %10, %11 : vector<32x256xf32>
    %13 = arith.mulf %7, %12 : vector<32x256xf32>
    %c0_7 = arith.constant 0 : index
    %c0_8 = arith.constant 0 : index
    %c0_9 = arith.constant 0 : index
    %14 = vector.load %arg5[%c0_7, %c0_8, %c0_9] : memref<1x4x32xf32, #tpu.memory_space<vmem>>, vector<1x4x32xf32>
    %15 = vector.shape_cast %14 : vector<1x4x32xf32> to vector<4x32xf32>
    %cst_10 = arith.constant dense<0.000000e+00> : vector<4x256xf32>
    %16 = tpu.matmul %15, %13, %cst_10 {dimension_numbers = #tpu.dot_dimension_numbers<[1], [0], [0], [1], [0, 0, 1, 1], [], []>} : vector<4x32xf32>, vector<32x256xf32>, vector<4x256xf32> -> vector<4x256xf32>
    %c0_11 = arith.constant 0 : index
    %c0_12 = arith.constant 0 : index
    %c0_13 = arith.constant 0 : index
    %17 = vector.load %arg6[%c0_11, %c0_12, %c0_13] : memref<1x4x1xf32, #tpu.memory_space<vmem>>, vector<1x4x1xf32>
    %18 = vector.shape_cast %17 : vector<1x4x1xf32> to vector<4x1xf32>
    %19 = vector.broadcast %18 : vector<4x1xf32> to vector<4x256xf32>
    %20 = arith.addf %16, %19 : vector<4x256xf32>
    %21 = arith.truncf %20 : vector<4x256xf32> to vector<4x256xbf16>
    %c0_14 = arith.constant 0 : index
    %c0_15 = arith.constant 0 : index
    %c0_16 = arith.constant 0 : index
    %22 = vector.load %arg7[%c0_14, %c0_15, %c0_16] : memref<1x4x256xbf16, #tpu.memory_space<vmem>>, vector<1x4x256xbf16>
    %23 = vector.shape_cast %22 : vector<1x4x256xbf16> to vector<4x256xbf16>
    %24 = vector.shape_cast %21 : vector<4x256xbf16> to vector<1x4x256xbf16>
    tpu.vector_store %arg7[%c0_14, %c0_15, %c0_16], %24 {strides = array<i32>} : memref<1x4x256xbf16, #tpu.memory_space<vmem>>, vector<1x4x256xbf16>,
    return
  }
  func.func @transform_0(%arg0: i32, %arg1: i32) -> (i32, i32, i32) {
    %c0_i32 = arith.constant 0 : i32
    %c0_i32_0 = arith.constant 0 : i32
    return %arg0, %c0_i32, %arg1 : i32, i32, i32
  }
  func.func @transform_1(%arg0: i32, %arg1: i32) -> (i32, i32) {
    %c0_i32 = arith.constant 0 : i32
    %c0_i32_0 = arith.constant 0 : i32
    %c0_i32_1 = arith.constant 0 : i32
    return %c0_i32, %c0_i32_0 : i32, i32
  }
  func.func @transform_2(%arg0: i32, %arg1: i32) -> (i32, i32) {
    %c0_i32 = arith.constant 0 : i32
    %c0_i32_0 = arith.constant 0 : i32
    %c0_i32_1 = arith.constant 0 : i32
    return %c0_i32, %c0_i32_0 : i32, i32
  }
  func.func @transform_3(%arg0: i32, %arg1: i32) -> (i32, i32, i32) {
    %c0_i32 = arith.constant 0 : i32
    %c0_i32_0 = arith.constant 0 : i32
    %c0_i32_1 = arith.constant 0 : i32
    return %arg0, %c0_i32, %c0_i32_0 : i32, i32, i32
  }
  func.func @transform_4(%arg0: i32, %arg1: i32) -> (i32, i32, i32) {
    %c0_i32 = arith.constant 0 : i32
    %c0_i32_0 = arith.constant 0 : i32
    %c0_i32_1 = arith.constant 0 : i32
    return %arg0, %c0_i32, %c0_i32_0 : i32, i32, i32
  }
  func.func @transform_5(%arg0: i32, %arg1: i32) -> (i32, i32, i32) {
    %c0_i32 = arith.constant 0 : i32
    %c0_i32_0 = arith.constant 0 : i32
    return %arg0, %c0_i32, %arg1 : i32, i32, i32
  }
}

</mosaic_0001>

<bundles_post_ra>
// kernel: tpu_custom_call.1
= control target key start
LH: loop header
LB: loop body
LE: loop exit
PB: predicated region body
PF: predicated region fallthrough
CT: control target
= control target key end

     0   :  { %10 = vsyncpa [#allocation3], 0  ;;  %s1297_s0 = inlined_call_operand.vmem [shape: bf16[2,8,256], index: 0, kind: input, shape index: {}]   ;;  %s1298_s1 = inlined_call_operand.vmem [shape: f32[32,8], index: 1, kind: input, shape index: {}]   ;;  %s1299_s2 = inlined_call_operand.vmem [shape: f32[32,1], index: 2, kind: input, shape index: {}]   ;;  %s1300_s3 = inlined_call_operand.vmem [shape: f32[2,4,32], index: 3, kind: input, shape index: {}]   ;;  %s1301_s4 = inlined_call_operand.vmem [shape: f32[2,4,1], index: 4, kind: input, shape index: {}]   ;;  %s1302_s5 = inlined_call_operand.hbm [shape: bf16[2,4,256], index: 5, kind: output, shape index: {}]  }
   0x1   :  { %12 = vsyncpa [#allocation3 + $0x1], 0  ;;  %s968_s18 = smov 0   ;;  %s970_s19 = smov 0  }
   0x2   :  { %s972_s20 = smov 0   ;;  %s974_s21 = smov 0  }
   0x3   :  { %s976_s22 = smov 0   ;;  %s978_s23 = smov 0  }
   0x4 LB: > { %s729_s24 = sadd.s32 4294967295, %s935_s23   ;;  %s730_s25 = sadd.s32 4294967294, %s935_s23   ;;  %s935_s23 = sphi %s978_s23, %s18_s23   ;;  %s931_s22 = sphi %s976_s22, %s1325_s22   ;;  %s927_s21 = sphi %s974_s21, %s1324_s21   ;;  %s923_s20 = sphi %s972_s20, %s1323_s20   ;;  %s919_s19 = sphi %s970_s19, %s1322_s19   ;;  %s915_s18 = sphi %s968_s18, %s1321_s18  }
   0x5   : > { %s30_s26 = sadd.s32 1, %s931_s22  ;;  %s161_s27 = sadd.s32 1, %s923_s20 }
   0x6   : > { %p32_p0 = scmp.ge.s32.totalorder %s30_s26, 2  ;;  %p171_p1 = scmp.ne.s32.totalorder %s923_s20, %s919_s19 }
   0x7   : > { %p172_p2 = scmp.eq.s32.totalorder %s729_s24, 1  ;;  %p177_p3 = scmp.ne.s32.totalorder %s919_s19, %s915_s18 }
   0x8   : > { %s1327_s26 = smov (%p32_p0, %s30_s26), 0  ;;  %p178_p5 = scmp.eq.s32.totalorder %s730_s25, 1 }
   0x9   : > { %p1008_p4 = por %p172_p2, %p171_p1  ;;  %s156_s29 = ssub.s32 %s931_s22, %s1327_s26 }
   0xa   : > { %p733_p6 = scmp.ge.s32.totalorder %s935_s23, 1  ;;  %p159_p7 = scmp.eq.s32.totalorder %s156_s29, 0 }
   0xb   : > { %p1015_p8 = por %p178_p5, %p177_p3  ;;  %p229_p9 = scmp.lt.s32.totalorder %s935_s23, 3 }
   0xc   : > { %s1021_s6 = scalar_select %p159_p7, %s923_s20, %s161_s27  }
   0xd   : > { %p230_p10 = pnand %p733_p6, %p229_p9 }
   0xe   : > { %p270_p11 = scmp.lt.s32.totalorder (!%p230_p10), %s927_s21, 1  ;;  %s763_s7 = sshll.u32 (!%p230_p10), %s927_s21, 2 }
   0xf   : > { %233 = sbr.rel (%p230_p10) target bundleno = 353 (0x161), region = 40  ;;  %s624_s10 = scalar_lea.hbm (!%p230_p10), %s1302_s5, %s763_s7 }
  0x10   : > { %s877_s25 = scalar_lea.hbm (!%p230_p10), %s1302_s5, 8 }
  0x14   : > { %v296_v0 = vld [vmem:[%s1299_s2 + $0x8] sm:$0xff]  ;;  %v937_v1 = vmov 0   ;;  %v298_v2 = vld [vmem:[%s1299_s2 + $0x18] sm:$0xff]  ;;  %s1031_s11 = scalar_select %p270_p11, %s927_s21, 1  ;;  %v291_v6 = vld [vmem:[%s1298_s1] sm:$0xff]  ;;  %vm319_vm0 = vcmask 64512  }
  0x15   : > { %823 = vset.pattern.permute.xlu1 %v937_v1  ;;  %822 = vset.pattern.permute.xlu0 %v937_v1  ;;  %v294_v7 = vld [vmem:[%s1298_s1 + $0x18] sm:$0xff]  ;;  %v295_v8 = vld [vmem:[%s1299_s2] sm:$0xff]  ;;  %v297_v9 = vld [vmem:[%s1299_s2 + $0x10] sm:$0xff] }
  0x16   : > { %306 = vperm.xlu1 %823, %v296_v0   ;;  %316 = vperm.xlu0 %822, %v298_v2   ;;  %s762_s12 = sshll.u32 %s1031_s11, 3  ;;  %v292_v10 = vld [vmem:[%s1298_s1 + $0x8] sm:$0xff]  ;;  %v293_v11 = vld [vmem:[%s1298_s1 + $0x10] sm:$0xff]  ;;  %s737_s14 = sshll.u32 %s1031_s11, 2 }
  0x17   : > { %824 = vset.pattern.permute.xlu2 %v937_v1  ;;  %s277_s15 = scalar_lea.vmem %s1297_s0, %s762_s12  ;;  %s286_s17 = scalar_lea.vmem %s1301_s4, %s737_s14 }
  0x18   : > { %v288_v3 = vld [vmem:[%s277_s15] sm:$0xff]  ;;  %s282_s27 = scalar_lea.vmem %s1300_s3, %s737_s14  ;;  %s266_s11 = sand.u32 1, %s919_s19  }
  0x19   : > { %v289_v4 = vunpack.c.l.bf16 %v288_v3  ;;  %v290_v5 = vunpack.c.h.bf16 %v288_v3  ;;  %v551_v55 = vld [vmem:[%s286_s17] sm:$0xf]  ;;  %s734_s29 = sshll.u32 %s266_s11, 2  ;;  %s628_s14 = sshll.u32 %s624_s10, 4  ;;  %s629_s14 = int_to_ptr.hbm [resolvable:$true] %s628_s14 }
  0x1a   : > { %554 = vperm.xlu2 %824, %v551_v55   ;;  %s268_s12 = scalar_lea.vmem [#allocation2], %s734_s29  ;;  %s611_s21 = scalar_lea.sflag [#allocation3], %s266_s11 }
  0x1b   : > { %347 = vmatpush.msra.mxu0 %v289_v4  ;;  %764 = vmatpush.msra.mxu2 %v289_v4  ;;  %s626_s13 = sshll.u32 %s268_s12, 4  ;;  %s871_s15 = sshra.s32 %s629_s14, 4  ;;  %s627_s13 = int_to_ptr.vmem [resolvable:$true] %s626_s13  ;;  %s872_s15 = int_to_ptr.hbm [resolvable:$true] %s871_s15 }
  0x1c   : > { %376 = vmatpush.msra.mxu1 %v290_v5  ;;  %765 = vmatpush.msra.mxu3 %v290_v5  ;;  %s873_s16 = scalar_lea.hbm %s872_s15, 4  ;;  %p878_p1 = scmp.lt.s32.totalorder %s872_s15, %s1302_s5 }
  0x1d   : > { %739 = vmatmul.msk.f32.vlgmr.msra.gmra.mxu0 %vm319_vm0, %v291_v6  ;;  %742 = vmatmul.msk.f32.vlgmr.msra.gmra.mxu2 %vm319_vm0, %v294_v7  ;;  %p874_p12 = scmp.ne.s32.totalorder %s872_s15, %s873_s16  ;;  %p879_p2 = scmp.lt.s32.totalorder %s877_s25, %s873_s16 }
  0x1e   : > { %743 = vmatmul.msk.f32.vlgmr.msra.gmra.mxu1 %vm319_vm0, %v291_v6  ;;  %746 = vmatmul.msk.f32.vlgmr.msra.gmra.mxu3 %vm319_vm0, %v294_v7 }
  0x1f   : > { %301 = vperm.xlu1 %823, %v295_v8   ;;  %311 = vperm.xlu0 %822, %v297_v9   ;;  %p875_p13 = pnand %p874_p12, %p1008_p4  ;;  %p880_p3 = por %p879_p2, %p878_p1 }
  0x21   : > { %p876_p0 = pneg %p875_p13 }
  0x23   : > { %p881_p5 = pnand %p880_p3, %p876_p0 }
  0x25   : > { %740 = vmatmul.msk.f32.gmra.mxu0 %vm319_vm0, %v292_v10 }
  0x26   : > { %744 = vmatmul.msk.f32.gmra.mxu1 %vm319_vm0, %v292_v10 }
  0x2d   : > { %741 = vmatmul.msk.f32.gmra.mxu0 %vm319_vm0, %v293_v11 }
  0x2e   : > { %745 = vmatmul.msk.f32.gmra.mxu1 %vm319_vm0, %v293_v11 }
  0x88   : > { %v307_v12 = vpop.permute.xlu1 %306  ;;  %v317_v20 = vpop.permute.xlu0 %316 }
  0x91   : > { %v302_v13 = vpop.permute.xlu1 %301  ;;  %v312_v37 = vpop.permute.xlu0 %311 }
  0x9a   : > { %v349_v14 = vpop.f32.mrf.mxu0 }
  0x9b   : > { %v1063_v15 = vadd.f32 %v349_v14, %v302_v13  ;;  %v378_v16 = vpop.f32.mrf.mxu1 }
  0x9c   : > { %v1065_v17 = vadd.f32 %v378_v16, %v302_v13 }
  0x9d   : > { %v747_v18 = vmul.f32 -1.442695, %v1063_v15 }
  0x9e   : > { %v748_v19 = vmul.f32 -1.442695, %v1065_v17 }
  0x9f   : > { %825 = vpow2.f32 %v747_v18 }
  0xa0   : > { %827 = vpow2.f32 %v748_v19  ;;  %v358_v21 = vpop.f32.mrf.mxu2 }
  0xa1   : > { %v1069_v22 = vadd.f32 %v358_v21, %v317_v20  ;;  %v387_v23 = vpop.f32.mrf.mxu3 }
  0xa2   : > { %v1071_v24 = vadd.f32 %v387_v23, %v317_v20  ;;  %v352_v25 = vpop.f32.mrf.mxu0 }
  0xa3   : > { %v753_v26 = vmul.f32 -1.442695, %v1069_v22  ;;  %v1074_v27 = vadd.f32 %v352_v25, %v307_v12  ;;  %v381_v28 = vpop.f32.mrf.mxu1 }
  0xa4   : > { %v754_v29 = vmul.f32 -1.442695, %v1071_v24  ;;  %v1077_v30 = vadd.f32 %v381_v28, %v307_v12 }
  0xa5   : > { %v826_v31 = vpop.eup %825  ;;  %829 = vpow2.f32 %v753_v26  ;;  %v749_v32 = vmul.f32 -1.442695, %v1074_v27 }
  0xa6   : > { %v828_v33 = vpop.eup %827  ;;  %831 = vpow2.f32 %v754_v29  ;;  %v750_v34 = vmul.f32 -1.442695, %v1077_v30  ;;  %v1081_v35 = vadd.f32 1.0, %v826_v31 }
  0xa7   : > { %833 = vpow2.f32 %v749_v32  ;;  %v1083_v36 = vadd.f32 1.0, %v828_v33 }
  0xa8   : > { %835 = vpow2.f32 %v750_v34  ;;  %v433_v53 = vand.u32 2147483648, %v1081_v35  ;;  %v431_v60 = vand.u32 2147483647, %v1081_v35  ;;  %vm427_vm6 = vweird.f32 %v1081_v35 }
  0xa9   : > { %837 = vrcp.f32 %v1081_v35  ;;  %v446_v61 = vand.u32 2147483647, %v1083_v36  ;;  %v448_v62 = vand.u32 2147483648, %v1083_v36  ;;  %vm442_vm11 = vweird.f32 %v1083_v36 }
  0xaa   : > { %v355_v38 = vpop.f32.mrf.mxu0  ;;  %839 = vrcp.f32 %v1083_v36  ;;  %v1119_v2 = vor.u32 1.1754944e-38, %v433_v53 }
  0xab   : > { %v830_v39 = vpop.eup %829  ;;  %v1085_v40 = vadd.f32 %v355_v38, %v312_v37  ;;  %v384_v41 = vpop.f32.mrf.mxu1 }
  0xac   : > { %v832_v42 = vpop.eup %831  ;;  %v420_v43 = vadd.f32 1.0, %v830_v39  ;;  %v1088_v44 = vadd.f32 %v384_v41, %v312_v37 }
  0xad   : > { %v834_v45 = vpop.eup %833  ;;  %v1091_v46 = vadd.f32 1.0, %v832_v42  ;;  %v751_v47 = vmul.f32 -1.442695, %v1085_v40 }
  0xae   : > { %841 = vrcp.f32 %v420_v43  ;;  %v1094_v48 = vadd.f32 1.0, %v834_v45  ;;  %v752_v49 = vmul.f32 -1.442695, %v1088_v44  ;;  %v836_v50 = vpop.eup %835  ;;  %v521_v57 = vand.u32 2147483647, %v420_v43 }
  0xaf   : > { %843 = vrcp.f32 %v1091_v46  ;;  %v1105_v51 = vadd.f32 1.0, %v836_v50  ;;  %v1107_v52 = vpop.eup %837  ;;  %vm517_vm1 = vweird.f32 %v420_v43  ;;  %v523_v0 = vand.u32 2147483648, %v420_v43 }
  0xb0   : > { %845 = vrcp.f32 %v1094_v48  ;;  %v1110_v54 = vpop.eup %839  ;;  %vm532_vm2 = vweird.f32 %v1091_v46  ;;  %v536_v5 = vand.u32 2147483647, %v1091_v46  ;;  %vm1127_vm3 = vcmp.eq.f32.partialorder %v521_v57, 8.507059e+37 }
  0xb1   : > { %847 = vpow2.f32 %v751_v47  ;;  %v538_v11 = vand.u32 2147483648, %v1091_v46  ;;  %v423_v14 = vmul.f32 %v1107_v52, %v1081_v35  ;;  %v438_v19 = vmul.f32 %v1110_v54, %v1083_v36 }
  0xb2   : > { %849 = vpow2.f32 %v752_v49  ;;  %v524_v21 = vor.u32 1.1754944e-38, %v523_v0  ;;  %vm537_vm8 = vcmp.eq.f32.partialorder %v536_v5, 8.507059e+37  ;;  %vm457_vm9 = vweird.f32 %v1094_v48 }
  0xb3   : > { %851 = vrcp.f32 %v1105_v51  ;;  %v539_v26 = vor.u32 1.1754944e-38, %v538_v11  ;;  %v461_v28 = vand.u32 2147483647, %v1094_v48  ;;  %v463_v31 = vand.u32 2147483648, %v1094_v48 }
  0xb4   : > { %v842_v56 = vpop.eup %841  ;;  %v424_v33 = vsub.f32 1.0, %v423_v14  ;;  %v476_v38 = vand.u32 2147483647, %v1105_v51  ;;  %v439_v39 = vsub.f32 1.0, %v438_v19  ;;  %vm472_vm12 = vweird.f32 %v1105_v51 }
  0xb5   : > { %v844_v58 = vpop.eup %843  ;;  %v513_v59 = vmul.f32 %v842_v56, %v420_v43  ;;  %vm518_vm4 = vweird.f32 %v842_v56  ;;  %v478_v49 = vand.u32 2147483648, %v1105_v51  ;;  %vm428_vm13 = vweird.f32 %v1107_v52 }
  0xb6   : > { %v1116_v63 = vpop.eup %845  ;;  %v528_v1 = vmul.f32 %v844_v58, %v1091_v46  ;;  %vm533_vm5 = vweird.f32 %v844_v58  ;;  %vm519_vm7 = vmor %vm517_vm1, %vm518_vm4  ;;  %vm1162_vm14 = vcmp.eq.f32.partialorder %v461_v28, 8.507059e+37  ;;  %v425_v57 = vmul.f32 %v1107_v52, %v424_v33 }
  0xb7   : > { %v848_v3 = vpop.eup %847  ;;  %v514_v4 = vsub.f32 1.0, %v513_v59  ;;  %v453_v6 = vmul.f32 %v1116_v63, %v1094_v48  ;;  %vm534_vm10 = vmor %vm532_vm2, %vm533_vm5  ;;  %vm458_vm15 = vweird.f32 %v1116_v63  ;;  %vm1170_vm0 = vcmp.eq.f32.partialorder %v476_v38, 8.507059e+37 }
  0xb8   : > { %v850_v7 = vpop.eup %849  ;;  %v1125_v8 = vadd.f32 1.0, %v848_v3  ;;  %v529_v10 = vsub.f32 1.0, %v528_v1  ;;  %v440_v59 = vmul.f32 %v1110_v54, %v439_v39  ;;  %vm443_vm1 = vweird.f32 %v1110_v54  ;;  %vm1192_vm4 = vmor %vm427_vm6, %vm428_vm13 }
  0xb9   : > { %v1132_v12 = vadd.f32 1.0, %v850_v7  ;;  %v515_v13 = vmul.f32 %v842_v56, %v514_v4  ;;  %v1136_v16 = vpop.eup %851  ;;  %v454_v23 = vsub.f32 1.0, %v453_v6  ;;  %vm1181_vm2 = vcmp.eq.f32.partialorder %v431_v60, 8.507059e+37  ;;  %vm1211_vm6 = vmor %vm442_vm11, %vm443_vm1 }
  0xba   : > { %853 = vrcp.f32 %v1125_v8  ;;  %v530_v18 = vmul.f32 %v844_v58, %v529_v10  ;;  %v468_v32 = vmul.f32 %v1136_v16, %v1105_v51  ;;  %v491_v1 = vand.u32 2147483647, %v1125_v8 }
  0xbb   : > { %855 = vrcp.f32 %v1132_v12  ;;  %v516_v20 = vadd.f32 %v842_v56, %v515_v13  ;;  %v455_v43 = vmul.f32 %v1116_v63, %v454_v23  ;;  %v493_v3 = vand.u32 2147483648, %v1125_v8 }
  0xbc   : > { %v531_v25 = vadd.f32 %v844_v58, %v530_v18  ;;  %v469_v45 = vsub.f32 1.0, %v468_v32  ;;  %v506_v7 = vand.u32 2147483647, %v1132_v12  ;;  %v508_v60 = vand.u32 2147483648, %v1132_v12 }
  0xbd   : > { %v520_v29 = vsel %vm519_vm7, %v842_v56, %v516_v20  ;;  %v456_v4 = vadd.f32 %v1116_v63, %v455_v43  ;;  %vm1201_vm7 = vmor %vm457_vm9, %vm458_vm15  ;;  %v426_v14 = vadd.f32 %v1107_v52, %v425_v57  ;;  %v479_v35 = vor.u32 1.1754944e-38, %v478_v49 }
  0xbe   : > { %v525_v34 = vsel %vm1127_vm3, %v524_v21, %v520_v29  ;;  %v535_v37 = vsel %vm534_vm10, %v844_v58, %v531_v25  ;;  %v470_v56 = vmul.f32 %v1136_v16, %v469_v45  ;;  %vm473_vm3 = vweird.f32 %v1136_v16 }
  0xbf   : > { %v548_v41 = vmul.f32 %v525_v34, %v1069_v22  ;;  %v540_v42 = vsel %vm537_vm8, %v539_v26, %v535_v37  ;;  %v464_v22 = vor.u32 1.1754944e-38, %v463_v31  ;;  %v441_v19 = vadd.f32 %v1110_v54, %v440_v59  ;;  %vm1224_vm13 = vmor %vm472_vm12, %vm473_vm3 }
  0xc0   : > { %v854_v46 = vpop.eup %853  ;;  %v549_v47 = vmul.f32 %v540_v42, %v1071_v24  ;;  %v471_v9 = vadd.f32 %v1136_v16, %v470_v56  ;;  %vm487_vm9 = vweird.f32 %v1125_v8  ;;  %vm502_vm10 = vweird.f32 %v1132_v12 }
  0xc1   : > { %v856_v50 = vpop.eup %855  ;;  %573 = vmatpush.msrb.mxu2 %v548_v41  ;;  %v483_v53 = vmul.f32 %v854_v46, %v1125_v8  ;;  %vm488_vm5 = vweird.f32 %v854_v46  ;;  %v460_v21 = vsel %vm1201_vm7, %v1116_v63, %v456_v4  ;;  %vm492_vm15 = vcmp.eq.f32.partialorder %v491_v1, 8.507059e+37 }
  0xc2   : > { %593 = vmatpush.msrb.mxu3 %v549_v47  ;;  %v498_v24 = vmul.f32 %v856_v50, %v1132_v12  ;;  %vm503_vm8 = vweird.f32 %v856_v50  ;;  %vm489_vm11 = vmor %vm487_vm9, %vm488_vm5  ;;  %v494_v25 = vor.u32 1.1754944e-38, %v493_v3  ;;  %v475_v8 = vsel %vm1224_vm13, %v1136_v16, %v471_v9 }
  0xc3   : > { %v484_v0 = vsub.f32 1.0, %v483_v53  ;;  %vm504_vm1 = vmor %vm502_vm10, %vm503_vm8  ;;  %vm507_vm7 = vcmp.eq.f32.partialorder %v506_v7, 8.507059e+37  ;;  %v509_v63 = vor.u32 1.1754944e-38, %v508_v60  ;;  %v430_v51 = vsel %vm1192_vm4, %v1107_v52, %v426_v14 }
  0xc4   : > { %v499_v6 = vsub.f32 1.0, %v498_v24  ;;  %v465_v31 = vsel %vm1162_vm14, %v464_v22, %v460_v21  ;;  %v445_v32 = vsel %vm1211_vm6, %v1110_v54, %v441_v19  ;;  %v480_v34 = vsel %vm1170_vm0, %v479_v35, %v475_v8 }
  0xc5   : > { %v485_v11 = vmul.f32 %v854_v46, %v484_v0  ;;  %v449_v37 = vor.u32 1.1754944e-38, %v448_v62  ;;  %v435_v38 = vsel %vm1181_vm2, %v1119_v2, %v430_v51  ;;  %vm447_vm12 = vcmp.eq.f32.partialorder %v446_v61, 8.507059e+37  ;;  %v550_v2 = vld [vmem:[%s282_s27] sm:$0xf]  ;;  %v555_v61 = vpop.permute.xlu2 %554 }
  0xc6   : > { %v500_v18 = vmul.f32 %v856_v50, %v499_v6  ;;  %v542_v62 = vmul.f32 %v435_v38, %v1063_v15  ;;  %vm557_vm14 = vcmask 261120   ;;  %vm604_vm0 = vcmask 1041408  }
  0xc7   : > { %v486_v48 = vadd.f32 %v854_v46, %v485_v11  ;;  %v450_v54 = vsel %vm447_vm12, %v449_v37, %v445_v32 }
  0xc8   : > { %v501_v26 = vadd.f32 %v856_v50, %v500_v18  ;;  %v543_v36 = vmul.f32 %v450_v54, %v1065_v17 }
  0xc9   : > { %v490_v12 = vsel %vm489_vm11, %v854_v46, %v486_v48 }
  0xca   : > { %v495_v28 = vsel %vm492_vm15, %v494_v25, %v490_v12  ;;  %v505_v29 = vsel %vm504_vm1, %v856_v50, %v501_v26 }
  0xcb   : > { %v546_v16 = vmul.f32 %v495_v28, %v1085_v40  ;;  %v510_v33 = vsel %vm507_vm7, %v509_v63, %v505_v29  ;;  %v544_v40 = vmul.f32 %v465_v31, %v1074_v27 }
  0xcc   : > { %v547_v52 = vmul.f32 %v510_v33, %v1088_v44  ;;  %v545_v44 = vmul.f32 %v480_v34, %v1077_v30 }
  0xcd   : > { %574 = vmatpush.msrb.mxu2 %v546_v16 }
  0xce   : > { %594 = vmatpush.msrb.mxu3 %v547_v52 }
  0xcf   : > { %575 = vmatpush.msrb.mxu2 %v544_v40 }
  0xd0   : > { %595 = vmatpush.msrb.mxu3 %v545_v44 }
  0xd1   : > { %576 = vmatpush.msrb.mxu2 %v542_v62 }
  0xd2   : > { %596 = vmatpush.msrb.mxu3 %v543_v36  ;;  %755 = vmatmul.msk.f32.vlgmr.msrb.gmra.mxu2 %vm557_vm14, %v550_v2 }
  0xd3   : > { %756 = vmatmul.msk.f32.vlgmr.msrb.gmra.mxu3 %vm557_vm14, %v550_v2 }
 0x155   : > { %v578_v27 = vpop.f32.mrf.mxu2 }
 0x156   : > { %v579_v39 = vadd.f32 %v578_v27, %v555_v61  ;;  %v598_v41 = vpop.f32.mrf.mxu3 }
 0x157   : > { %v599_v15 = vadd.f32 %v598_v41, %v555_v61 }
 0x159   : > { %v601_v30 = vpack.c.bf16 %v599_v15, %v579_v39 }
 0x15b   : > { %v603_v17 = vrot.slane %v601_v30, 2 }
 0x15d   : > { %v607_v42 = vsel %vm604_vm0, %v601_v30, %v603_v17 }
 0x15e   : > { %609 = vst [vmem:[%s268_s12] sm:$0xf] %v607_v42 }
 0x15f   : > { %884 = shalt.err (!%p881_p5)
}
 0x160   : > { %766 = dma.vmem_to_hbm [thread:$0]  (%p1008_p4), %s627_s13, 64, %s629_s14, %s611_s21  }
 0x161 PF: > { %p772_p6 = scmp.ge.s32.totalorder %s935_s23, 2  ;;  %s640_s11 = sand.u32 1, %s915_s18  }
 0x162   : > { %s641_s7 = scalar_lea.sflag [#allocation3], %s640_s11 }
 0x163   : > { %p769_p7 = pnand %p772_p6, %p1015_p8 }
 0x165   : > { %p770_p9 = pneg %p769_p7 }
 0x167   : > { %910 = dma.done.wait (%p770_p9), %s641_s7, 64  }
 0x168   : > { %912 = vsyncadd (%p770_p9), %s641_s7, 4294967232  ;;  %s18_s23 = sadd.s32 1, %s935_s23   ;;  %s1321_s18 = smov %s919_s19 }
 0x169   : > { %p15_p10 = scmp.ge.s32.totalorder %s18_s23, 4   ;;  %s1322_s19 = smov %s923_s20 }
 0x16a   : > { %s1323_s20 = smov %s1021_s6  ;;  %s1324_s21 = smov %s931_s22 }
 0x16b   : > { %s1325_s22 = smov %s1327_s26  ;;  %17 = sbr.rel (!%p15_p10) target bundleno = 4 (0x4), region = 81 }
 0x170   :  { %647 = vsyncpa [#allocation3], 1 }
 0x171   :  { %649 = vsyncpa [#allocation3 + $0x1], 1 }

</bundles_post_ra>
